<compile_context>
chip_gen: v7x
topology: tpu7x:2x2x1
jax: 0.10.0
libtpu: 0.0.40
codegen_flags: <defaults>
</compile_context>

<pallas_src>
import functools

import jax
import jax.numpy as jnp
from jax.experimental import pallas as pl
from jax.experimental.pallas import tpu as pltpu


def bert_self_output_kernel(h_ref, x_ref, w_ref, b_ref, g_ref, beta_ref,
                            o_ref, *, eps):
    # Dense projection on the MXU: native-dtype operands, f32 accumulation.
    proj = jnp.dot(h_ref[...], w_ref[...], preferred_element_type=jnp.float32)

    # Dropout is identity in eval mode.
    # TODO(synk): training-mode dropout (pltpu.prng_random_bits mask) not wired in.

    # Bias folded into the residual add; all epilogue math in f32.
    resid = x_ref[...].astype(jnp.float32) + b_ref[...].astype(jnp.float32)
    y = proj + resid

    # LayerNorm over the hidden (last) axis, biased variance like PyTorch.
    mean = jnp.mean(y, axis=-1, keepdims=True)
    centered = y - mean
    var = jnp.mean(centered * centered, axis=-1, keepdims=True)
    norm = centered * jax.lax.rsqrt(var + eps)
    out = norm * g_ref[...].astype(jnp.float32) + beta_ref[...].astype(jnp.float32)

    o_ref[...] = out.astype(o_ref.dtype)


def _round_up(x, m):
    return (x + m - 1) // m * m


def bert_self_output(hidden_states, input_tensor, w_t, bias, gamma, beta,
                     *, eps=1e-12, row_tile=512):
    """hidden_states, input_tensor: [M, H]; w_t: [H, H] (already transposed);
    bias/gamma/beta: [1, H].  H must be a multiple of 128 (lane-dense)."""
    M, H = hidden_states.shape
    assert H % 128 == 0, "hidden size must be a multiple of 128 (lane-dense)"
    assert w_t.shape == (H, H)

    # Clamp the row tile for small inputs; keep it a multiple of 8 (sublanes).
    rt = _round_up(min(row_tile, _round_up(M, 8)), 8)
    M_pad = _round_up(M, rt)
    if M_pad != M:
        pad = M_pad - M
        hidden_states = jnp.pad(hidden_states, ((0, pad), (0, 0)))
        input_tensor = jnp.pad(input_tensor, ((0, pad), (0, 0)))

    grid = (M_pad // rt,)
    kernel = functools.partial(bert_self_output_kernel, eps=eps)

    out = pl.pallas_call(
        kernel,
        out_shape=jax.ShapeDtypeStruct((M_pad, H), hidden_states.dtype),
        grid_spec=pltpu.PrefetchScalarGridSpec(
            num_scalar_prefetch=0,
            grid=grid,
            in_specs=[
                # Streamed, double-buffered row tiles.
                pl.BlockSpec((rt, H), lambda i: (i, 0)),   # hidden_states
                pl.BlockSpec((rt, H), lambda i: (i, 0)),   # input_tensor
                # Resident parameters: whole array in VMEM, loaded once,
                # single-buffered (no per-step double buffering).
                pl.BlockSpec(memory_space=pltpu.MemorySpace.VMEM),  # W^T
                pl.BlockSpec(memory_space=pltpu.MemorySpace.VMEM),  # bias
                pl.BlockSpec(memory_space=pltpu.MemorySpace.VMEM),  # gamma
                pl.BlockSpec(memory_space=pltpu.MemorySpace.VMEM),  # beta
            ],
            out_specs=pl.BlockSpec((rt, H), lambda i: (i, 0)),
        ),
        compiler_params=pltpu.CompilerParams(
            dimension_semantics=("parallel",),
            vmem_limit_bytes=48 * 1024 * 1024,   # safe headroom on v7x (64 MiB)
        ),
    )(hidden_states, input_tensor, w_t, bias, gamma, beta)

    return out[:M] if M_pad != M else out


def _reference(h2d, x2d, w, b, gamma, beta, eps):
    ref = h2d @ w.T + b
    ref = ref + x2d
    mu = ref.mean(axis=-1, keepdims=True)
    var = ((ref - mu) ** 2).mean(axis=-1, keepdims=True)
    return (ref - mu) / jnp.sqrt(var + eps) * gamma + beta


if __name__ == "__main__":
    # Small but lane-dense config: batch=2, seq=256, hidden=128.
    B, S, H = 2, 256, 128
    eps = 1e-12

    key = jax.random.PRNGKey(0)
    k_h, k_x, k_w, k_b = jax.random.split(key, 4)

    hidden_states = jax.random.normal(k_h, (B, S, H), dtype=jnp.float32)
    input_tensor = jax.random.normal(k_x, (B, S, H), dtype=jnp.float32)

    # Deterministic synthetic parameters.
    # nn.Linear(H, H): weight [H_out, H_in], bias [H_out].
    w = jax.random.normal(k_w, (H, H), dtype=jnp.float32) * (1.0 / jnp.sqrt(H))
    b = jax.random.normal(k_b, (H,), dtype=jnp.float32) * 0.02
    gamma = jnp.ones((H,), dtype=jnp.float32)
    beta = jnp.zeros((H,), dtype=jnp.float32)

    # Flatten [B, S, H] -> [B*S, H]; pre-transpose weight to [H_in, H_out].
    h2d = hidden_states.reshape(B * S, H)
    x2d = input_tensor.reshape(B * S, H)
    w_t = w.T
    b2d = b.reshape(1, H)
    g2d = gamma.reshape(1, H)
    beta2d = beta.reshape(1, H)

    ref2d = _reference(h2d, x2d, w, b, gamma, beta, eps)

    # Multi-step grid path (M = 512, row_tile = 256 -> grid of 2 steps).
    out2d = bert_self_output(h2d, x2d, w_t, b2d, g2d, beta2d,
                             eps=eps, row_tile=256)
    out = out2d.reshape(B, S, H)
    jax.block_until_ready(out)
    assert jnp.allclose(out, ref2d.reshape(B, S, H), atol=1e-5, rtol=1e-5), \
        "mismatch vs reference"

    # Default (large) row tile: whole M in one grid step after clamping.
    out2d_big = bert_self_output(h2d, x2d, w_t, b2d, g2d, beta2d, eps=eps)
    jax.block_until_ready(out2d_big)
    assert jnp.allclose(out2d_big, ref2d, atol=1e-5, rtol=1e-5), \
        "mismatch vs reference (default-tile path)"

    # Small / ragged row count exercises the clamp+pad path (M = 40 rows).
    M2 = 40
    out_small = bert_self_output(h2d[:M2], x2d[:M2], w_t, b2d, g2d, beta2d,
                                 eps=eps)
    jax.block_until_ready(out_small)
    assert jnp.allclose(out_small, ref2d[:M2], atol=1e-5, rtol=1e-5), \
        "mismatch vs reference (small-M path)"

    print("KERNEL_OK")
</pallas_src>

<mosaic_0001>
module attributes {stable_mosaic.version = 11 : i64} {
  func.func @bert_self_output_kernel(%arg0: i32, %arg1: memref<256x128xf32, #tpu.memory_space<vmem>>, %arg2: memref<256x128xf32, #tpu.memory_space<vmem>>, %arg3: memref<128x128xf32, #tpu.memory_space<vmem>>, %arg4: memref<1x128xf32, #tpu.memory_space<vmem>>, %arg5: memref<1x128xf32, #tpu.memory_space<vmem>>, %arg6: memref<1x128xf32, #tpu.memory_space<vmem>>, %arg7: memref<256x128xf32, #tpu.memory_space<vmem>>) attributes {dimension_semantics = [#tpu.dimension_semantics<parallel>], iteration_bounds = array<i64: 2>, scalar_prefetch = 0 : i64, scratch_operands = 0 : i64, tpu.core_type = #tpu.core_type<tc>, window_params = [{transform_indices = @transform_0, window_bounds = array<i64: 256, 128>}, {transform_indices = @transform_1, window_bounds = array<i64: 256, 128>}, {pipeline_mode = #tpu.pipeline_mode<synchronous>, transform_indices = @transform_2, window_bounds = array<i64: 128, 128>}, {pipeline_mode = #tpu.pipeline_mode<synchronous>, transform_indices = @transform_3, window_bounds = array<i64: 1, 128>}, {pipeline_mode = #tpu.pipeline_mode<synchronous>, transform_indices = @transform_4, window_bounds = array<i64: 1, 128>}, {pipeline_mode = #tpu.pipeline_mode<synchronous>, transform_indices = @transform_5, window_bounds = array<i64: 1, 128>}, {transform_indices = @transform_6, window_bounds = array<i64: 256, 128>}]} {
    %c0 = arith.constant 0 : index
    %c0_0 = arith.constant 0 : index
    %0 = vector.load %arg1[%c0, %c0_0] : memref<256x128xf32, #tpu.memory_space<vmem>>, vector<256x128xf32>
    %c0_1 = arith.constant 0 : index
    %c0_2 = arith.constant 0 : index
    %1 = vector.load %arg3[%c0_1, %c0_2] : memref<128x128xf32, #tpu.memory_space<vmem>>, vector<128x128xf32>
    %cst = arith.constant dense<0.000000e+00> : vector<256x128xf32>
    %2 = tpu.matmul %0, %1, %cst {dimension_numbers = #tpu.dot_dimension_numbers<[1], [0], [0], [1], [0, 0, 1, 1], [], []>} : vector<256x128xf32>, vector<128x128xf32>, vector<256x128xf32> -> vector<256x128xf32>
    %c0_3 = arith.constant 0 : index
    %c0_4 = arith.constant 0 : index
    %3 = vector.load %arg2[%c0_3, %c0_4] : memref<256x128xf32, #tpu.memory_space<vmem>>, vector<256x128xf32>
    %c0_5 = arith.constant 0 : index
    %c0_6 = arith.constant 0 : index
    %4 = vector.load %arg4[%c0_5, %c0_6] : memref<1x128xf32, #tpu.memory_space<vmem>>, vector<1x128xf32>
    %5 = vector.broadcast %4 : vector<1x128xf32> to vector<256x128xf32>
    %6 = arith.addf %3, %5 : vector<256x128xf32>
    %7 = arith.addf %2, %6 : vector<256x128xf32>
    %cst_7 = arith.constant dense<0.000000e+00> : vector<256xf32>
    %8 = vector.multi_reduction <add>, %7, %cst_7 [1] : vector<256x128xf32> to vector<256xf32>
    %9 = vector.shape_cast %8 : vector<256xf32> to vector<256x1xf32>
    %cst_8 = arith.constant 1.280000e+02 : f32
    %10 = vector.broadcast %cst_8 : f32 to vector<256x1xf32>
    %11 = arith.divf %9, %10 : vector<256x1xf32>
    %12 = vector.broadcast %11 : vector<256x1xf32> to vector<256x128xf32>
    %13 = arith.subf %7, %12 : vector<256x128xf32>
    %14 = arith.mulf %13, %13 : vector<256x128xf32>
    %cst_9 = arith.constant dense<0.000000e+00> : vector<256xf32>
    %15 = vector.multi_reduction <add>, %14, %cst_9 [1] : vector<256x128xf32> to vector<256xf32>
    %16 = vector.shape_cast %15 : vector<256xf32> to vector<256x1xf32>
    %cst_10 = arith.constant 1.280000e+02 : f32
    %17 = vector.broadcast %cst_10 : f32 to vector<256x1xf32>
    %18 = arith.divf %16, %17 : vector<256x1xf32>
    %cst_11 = arith.constant 9.99999996E-13 : f32
    %19 = vector.broadcast %cst_11 : f32 to vector<256x1xf32>
    %20 = arith.addf %18, %19 : vector<256x1xf32>
    %21 = math.rsqrt %20 : vector<256x1xf32>
    %22 = vector.broadcast %21 : vector<256x1xf32> to vector<256x128xf32>
    %23 = arith.mulf %13, %22 : vector<256x128xf32>
    %c0_12 = arith.constant 0 : index
    %c0_13 = arith.constant 0 : index
    %24 = vector.load %arg5[%c0_12, %c0_13] : memref<1x128xf32, #tpu.memory_space<vmem>>, vector<1x128xf32>
    %25 = vector.broadcast %24 : vector<1x128xf32> to vector<256x128xf32>
    %26 = arith.mulf %23, %25 : vector<256x128xf32>
    %c0_14 = arith.constant 0 : index
    %c0_15 = arith.constant 0 : index
    %27 = vector.load %arg6[%c0_14, %c0_15] : memref<1x128xf32, #tpu.memory_space<vmem>>, vector<1x128xf32>
    %28 = vector.broadcast %27 : vector<1x128xf32> to vector<256x128xf32>
    %29 = arith.addf %26, %28 : vector<256x128xf32>
    %c0_16 = arith.constant 0 : index
    %c0_17 = arith.constant 0 : index
    %30 = vector.load %arg7[%c0_16, %c0_17] : memref<256x128xf32, #tpu.memory_space<vmem>>, vector<256x128xf32>
    tpu.vector_store %arg7[%c0_16, %c0_17], %29 {strides = array<i32>} : memref<256x128xf32, #tpu.memory_space<vmem>>, vector<256x128xf32>,
    return
  }
  func.func @transform_0(%arg0: i32) -> (i32, i32) {
    %c0_i32 = arith.constant 0 : i32
    %c0_i32_0 = arith.constant 0 : i32
    return %arg0, %c0_i32 : i32, i32
  }
  func.func @transform_1(%arg0: i32) -> (i32, i32) {
    %c0_i32 = arith.constant 0 : i32
    %c0_i32_0 = arith.constant 0 : i32
    return %arg0, %c0_i32 : i32, i32
  }
  func.func @transform_2(%arg0: i32) -> (i32, i32) {
    %c0_i32 = arith.constant 0 : i32
    %c0_i32_0 = arith.constant 0 : i32
    %c0_i32_1 = arith.constant 0 : i32
    return %c0_i32, %c0_i32_0 : i32, i32
  }
  func.func @transform_3(%arg0: i32) -> (i32, i32) {
    %c0_i32 = arith.constant 0 : i32
    %c0_i32_0 = arith.constant 0 : i32
    %c0_i32_1 = arith.constant 0 : i32
    return %c0_i32, %c0_i32_0 : i32, i32
  }
  func.func @transform_4(%arg0: i32) -> (i32, i32) {
    %c0_i32 = arith.constant 0 : i32
    %c0_i32_0 = arith.constant 0 : i32
    %c0_i32_1 = arith.constant 0 : i32
    return %c0_i32, %c0_i32_0 : i32, i32
  }
  func.func @transform_5(%arg0: i32) -> (i32, i32) {
    %c0_i32 = arith.constant 0 : i32
    %c0_i32_0 = arith.constant 0 : i32
    %c0_i32_1 = arith.constant 0 : i32
    return %c0_i32, %c0_i32_0 : i32, i32
  }
  func.func @transform_6(%arg0: i32) -> (i32, i32) {
    %c0_i32 = arith.constant 0 : i32
    %c0_i32_0 = arith.constant 0 : i32
    return %arg0, %c0_i32 : i32, i32
  }
}

</mosaic_0001>

<bundles_post_ra>
// kernel: tpu_custom_call.1
= control target key start
LH: loop header
LB: loop body
LE: loop exit
PB: predicated region body
PF: predicated region fallthrough
CT: control target
= control target key end

     0   :  { %s2552_s0 = inlined_call_operand.hbm [shape: f32[512,128], index: 0, kind: input, shape index: {}]   ;;  %s2553_s1 = inlined_call_operand.hbm [shape: f32[512,128], index: 1, kind: input, shape index: {}]   ;;  %s2554_s2 = inlined_call_operand.hbm [shape: f32[128,128], index: 2, kind: input, shape index: {}]   ;;  %s2555_s3 = inlined_call_operand.vmem [shape: f32[1,128], index: 3, kind: input, shape index: {}]   ;;  %s2556_s4 = inlined_call_operand.vmem [shape: f32[1,128], index: 4, kind: input, shape index: {}]   ;;  %s2557_s5 = inlined_call_operand.vmem [shape: f32[1,128], index: 5, kind: input, shape index: {}]   ;;  %s2558_s6 = inlined_call_operand.hbm [shape: f32[512,128], index: 6, kind: output, shape index: {}]  }
   0x1   :  { %2569 = sst [smem:[#allocation16_spill]] %s2552_s0 }
   0x2   :  { %2570 = sst [smem:[#allocation17_spill]] %s2554_s2 }
   0x3   :  { %11 = vsyncpa [#allocation3], 0 }
   0x4   :  { %13 = vsyncpa [#allocation3 + $0x1], 0 }
   0x5   :  { %14 = vsyncpa [#allocation6], 0 }
   0x6   :  { %16 = vsyncpa [#allocation6 + $0x1], 0 }
   0x7   :  { %17 = vsyncpa [#allocation4], 0 }
   0x8   :  { %19 = vsyncpa [#allocation4 + $0x1], 0  ;;  %s1792_s21 = smov 0   ;;  %s1794_s22 = smov 0  }
   0x9   :  { %s1796_s23 = smov 0   ;;  %s1798_s24 = smov 0  }
   0xa LB: > { %2571 = sst [smem:[#allocation13_spill]] %s1743_s23  ;;  %s1813_s25 = sadd.s32 4294967295, %s1747_s24   ;;  %s1747_s24 = sphi %s1798_s24, %s2591_s24   ;;  %s1743_s23 = sphi %s1796_s23, %s2593_s23   ;;  %s1739_s22 = sphi %s1794_s22, %s2595_s22   ;;  %s1735_s21 = sphi %s1792_s21, %s2594_s21  }
   0xb   : > { %s1253_s26 = sadd.s32 4294967294, %s1747_s24   ;;  %p45_p0 = scmp.ne.s32.totalorder %s1739_s22, %s1735_s21 }
   0xc   : > { %p2559_p1 = scmp.eq.s32.totalorder %s1813_s25, 0  ;;  %p185_p3 = scmp.eq.s32.totalorder %s1253_s26, 1 }
   0xd   : > { %p1254_p5 = scmp.ge.s32.totalorder %s1747_s24, 1  ;;  %p192_p7 = scmp.lt.s32.totalorder %s1747_s24, 3 }
   0xe   : > { %p1822_p4 = por %p2559_p1, %p45_p0  ;;  %p1827_p6 = por %p185_p3, %p45_p0 }
   0xf   : > { %p1832_p8 = pnand %p1254_p5, %p192_p7  ;;  %s1749_s30 = smov [#allocation7]  }
  0x10   : > { %s2572_s27 = scalar_select %p1822_p4, 1, 0 }
  0x11   : > { %s2573_s28 = scalar_select %p1827_p6, 1, 0 }
  0x12   : > { %s2574_s29 = scalar_select %p1832_p8, 1, 0 }
  0x13   : > { %s204_s7 = sshll.u32 %s1749_s30, 4  ;;  %p1465_p9 = pneg %p1832_p8  ;;  %s1836_s7 = int_to_ptr.vmem [resolvable:$true] %s204_s7 }
  0x14   : > { %s1848_s9 = sadd.s32 1, %s1747_s24   ;;  %s32_s10 = sadd.s32 1, %s1743_s23 }
  0x15   : > { %p1843_p11 = pnand %p1465_p9, %p2559_p1  ;;  %2576 = sst [smem:[#allocation14_spill]] %s1848_s9 }
  0x16   : > { %s29_s11 = ssub.s32 %s1747_s24, %s1848_s9  ;;  %s2577_s2 = sld [smem:[#allocation17_spill]] }
  0x17   : > { %p1587_p13 = pneg %p1843_p11 }
  0x1c   : > { %s1585_s14 = scalar_lea.hbm %s2577_s2, 2048 }
  0x1d   : > { %p1586_p12 = scmp.ne.s32.totalorder %s2577_s2, %s1585_s14  ;;  %p1592_p5 = scmp.lt.u32.totalorder %s1585_s14, %s2577_s2 }
  0x1f   : > { %p1588_p0 = pnand %p1587_p13, %p1586_p12 }
  0x21   : > { %p1589_p3 = pneg %p1588_p0 }
  0x23   : > { %p1594_p7 = pnand %p1592_p5, %p1589_p3 }
  0x25   : > { %1597 = shalt.err (!%p1594_p7)
}
  0x26   : > { %s1598_s19 = scalar_lea.vmem %s1836_s7, 2048  ;;  %p1606_p2 = scmp.lt.s32.totalorder %s1836_s7, %s1836_s7 }
  0x27   : > { %p1599_p9 = scmp.ne.s32.totalorder %s1836_s7, %s1598_s19  ;;  %p1607_p6 = scmp.lt.s32.totalorder %s1598_s19, %s1598_s19 }
  0x29   : > { %p1601_p10 = pnand %p1599_p9, %p1587_p13  ;;  %p1608_p4 = por %p1607_p6, %p1606_p2 }
  0x2b   : > { %p1602_p1 = pneg %p1601_p10 }
  0x2d   : > { %p1609_p8 = pnand %p1608_p4, %p1602_p1 }
  0x2f   : > { %1612 = shalt.err (!%p1609_p8)
}
  0x30   : > { %s2562_s20 = smov 128   ;;  %s2564_s26 = smov 8  }
  0x31   : > { %1468 = dma.hbm_to_vmem [thread:$0]  (!%p1843_p11), %s2577_s2, 2048, %s1836_s7, [#allocation6], %s2562_s20, %s2562_s20, %s2564_s26  }
  0x32   : > { %p30_p1 = scmp.eq.s32.totalorder %s29_s11, 0  ;;  %p39_p2 = scmp.ne.s32.totalorder %s1743_s23, %s1739_s22 }
  0x33   : > { %p40_p4 = scmp.eq.s32.totalorder %s1747_s24, 0  ;;  %p1481_p6 = scmp.lt.s32.totalorder %s1747_s24, 2 }
  0x34   : > { %s1882_s13 = scalar_select %p30_p1, %s1743_s23, %s32_s10  }
  0x35   : > { %p41_p8 = por %p40_p4, %p39_p2  ;;  %p2579_p10 = scmp.eq.s32.totalorder %s1813_s25, 1 }
  0x36   : > { %2578 = sst [smem:[#allocation15_spill]] %s1882_s13  ;;  %s227_s8 = sand.u32 1, %s1743_s23  }
  0x37   : > { %p1886_p12 = por %p2579_p10, %p39_p2  ;;  %s1276_s15 = sshll.u32 %s1747_s24, 12 }
  0x38   : > { %s1892_s16 = sshll.u32 %s227_s8, 8  ;;  %s2581_s0 = sld [smem:[#allocation16_spill]] }
  0x39   : > { %s231_s10 = scalar_lea.vmem [#allocation2], %s1892_s16  ;;  %p1900_p11 = pnand %p1481_p6, %p41_p8 }
  0x3a   : > { %s238_s11 = sshll.u32 %s231_s10, 4  ;;  %s1909_s17 = scalar_lea.hbm %s2553_s1, %s1276_s15  ;;  %s1904_s11 = int_to_ptr.vmem [resolvable:$true] %s238_s11 }
  0x3b   : > { %s1911_s18 = scalar_lea.sflag [#allocation3], %s227_s8  ;;  %p1615_p0 = pneg %p1900_p11 }
  0x3e   : > { %s1897_s7 = scalar_lea.hbm %s2581_s0, %s1276_s15  ;;  %s1618_s2 = scalar_lea.hbm %s2581_s0, 8192 }
  0x3f   : > { %s1613_s20 = scalar_lea.hbm %s1897_s7, 4096  ;;  %p1619_p7 = scmp.lt.u32.totalorder %s1897_s7, %s2581_s0 }
  0x40   : > { %p1614_p13 = scmp.ne.s32.totalorder %s1897_s7, %s1613_s20  ;;  %p1620_p9 = scmp.lt.u32.totalorder %s1618_s2, %s1613_s20 }
  0x41   : > { %p1622_p2 = scmp.lt.u32.totalorder %s1613_s20, %s1897_s7 }
  0x42   : > { %p1616_p3 = pnand %p1615_p0, %p1614_p13  ;;  %p1621_p1 = por %p1620_p9, %p1619_p7 }
  0x44   : > { %p1617_p5 = pneg %p1616_p3  ;;  %p1623_p4 = por %p1622_p2, %p1621_p1 }
  0x46   : > { %p1624_p6 = pnand %p1623_p4, %p1617_p5 }
  0x48   : > { %1627 = shalt.err (!%p1624_p6)
}
  0x49   : > { %s1628_s8 = scalar_lea.vmem %s1904_s11, 4096  ;;  %s1752_s26 = smov [#allocation2]  }
  0x4a   : > { %p1629_p8 = scmp.ne.s32.totalorder %s1904_s11, %s1628_s8  ;;  %s1633_s15 = sshll.u32 %s1752_s26, 4  ;;  %s1634_s15 = int_to_ptr.vmem [resolvable:$false] %s1633_s15 }
  0x4b   : > { %s1635_s23 = scalar_lea.vmem %s1634_s15, 8192  ;;  %p1636_p3 = scmp.lt.s32.totalorder %s1904_s11, %s1634_s15 }
  0x4c   : > { %p1631_p10 = pnand %p1629_p8, %p1615_p0  ;;  %p1637_p7 = scmp.lt.s32.totalorder %s1635_s23, %s1628_s8 }
  0x4e   : > { %p1632_p13 = pneg %p1631_p10  ;;  %p1638_p9 = por %p1637_p7, %p1636_p3 }
  0x50   : > { %p1639_p1 = pnand %p1638_p9, %p1632_p13 }
  0x52   : > { %1642 = shalt.err (!%p1639_p1)
}
  0x53   : > { %s2583_s2 = smov 8   ;;  %s2584_s20 = smov 128  }
  0x54   : > { %1472 = dma.hbm_to_vmem [thread:$0]  (!%p1900_p11), %s1897_s7, 4096, %s1904_s11, %s1911_s18, %s2584_s20, %s2584_s20, %s2583_s2  }
  0x55   : > { %s252_s13 = scalar_lea.vmem [#allocation5], %s1892_s16  ;;  %s248_s12 = sand.u32 1, %s1747_s24  }
  0x56   : > { %s259_s30 = sshll.u32 %s252_s13, 4  ;;  %s1946_s10 = scalar_lea.sflag [#allocation6], %s248_s12  ;;  %s1944_s30 = int_to_ptr.vmem [resolvable:$true] %s259_s30 }
  0x57   : > { %s1643_s8 = scalar_lea.hbm %s1909_s17, 4096  ;;  %s1648_s23 = scalar_lea.hbm %s2553_s1, 8192 }
  0x58   : > { %p1644_p5 = scmp.ne.s32.totalorder %s1909_s17, %s1643_s8  ;;  %p1649_p6 = scmp.lt.u32.totalorder %s1909_s17, %s2553_s1 }
  0x59   : > { %p1650_p8 = scmp.lt.u32.totalorder %s1648_s23, %s1643_s8  ;;  %p1652_p13 = scmp.lt.u32.totalorder %s1643_s8, %s1909_s17 }
  0x5a   : > { %p1646_p2 = pnand %p1644_p5, %p1615_p0 }
  0x5b   : > { %p1651_p10 = por %p1650_p8, %p1649_p6 }
  0x5c   : > { %p1647_p4 = pneg %p1646_p2 }
  0x5d   : > { %p1653_p3 = por %p1652_p13, %p1651_p10 }
  0x5f   : > { %p1654_p7 = pnand %p1653_p3, %p1647_p4 }
  0x61   : > { %1657 = shalt.err (!%p1654_p7)
}
  0x62   : > { %s1658_s16 = scalar_lea.vmem %s1944_s30, 4096  ;;  %s1753_s7 = smov [#allocation5]  }
  0x63   : > { %p1659_p9 = scmp.ne.s32.totalorder %s1944_s30, %s1658_s16  ;;  %s1663_s11 = sshll.u32 %s1753_s7, 4  ;;  %s1664_s11 = int_to_ptr.vmem [resolvable:$false] %s1663_s11 }
  0x64   : > { %s1665_s0 = scalar_lea.vmem %s1664_s11, 8192  ;;  %p1666_p2 = scmp.lt.s32.totalorder %s1944_s30, %s1664_s11 }
  0x65   : > { %p1661_p1 = pnand %p1659_p9, %p1615_p0  ;;  %p1667_p6 = scmp.lt.s32.totalorder %s1665_s0, %s1658_s16 }
  0x67   : > { %p1662_p5 = pneg %p1661_p1  ;;  %p1668_p8 = por %p1667_p6, %p1666_p2 }
  0x69   : > { %p1669_p10 = pnand %p1668_p8, %p1662_p5 }
  0x6b   : > { %1672 = shalt.err (!%p1669_p10)
}
  0x6c   : > { %1475 = dma.hbm_to_vmem [thread:$0]  (!%p1900_p11), %s1909_s17, 4096, %s1944_s30, %s1946_s10, %s2584_s20, %s2584_s20, %s2583_s2  }
  0x6d   : > { %p2585_p0 = scmp.ne.s32.totalorder %s2574_s29, 0 }
  0x6e   : > { %s1978_s9 = sand.u32 (!%p2585_p0), 1, %s1739_s22   ;;  %p2586_p4 = scmp.ne.s32.totalorder (!%p2585_p0), %s2572_s27, 0 }
  0x6f   : > { %271 = sbr.rel (%p2585_p0) target bundleno = 765 (0x2fd), region = 44  ;;  %s1981_s18 = sshll.u32 (!%p2585_p0), %s1978_s9, 8 }
  0x70   : > { %s274_s19 = scalar_lea.sflag (!%p2585_p0), [#allocation3], %s1978_s9  ;;  %s1985_s13 = scalar_lea.vmem (!%p2585_p0), [#allocation2], %s1981_s18 }
  0x76   : > { %1718 = dma.done.wait (%p2586_p4), %s274_s19, 4096  }
  0x77   : > { %1720 = vsyncadd (%p2586_p4), %s274_s19, 4294963200  ;;  %s282_s29 = sand.u32 1, %s1813_s25   ;;  %s1993_s2 = scalar_lea.vmem [#allocation5], %s1981_s18 }
  0x78   : > { %s283_s17 = scalar_lea.sflag [#allocation6], %s282_s29 }
  0x79   : > { %1722 = dma.done.wait (%p2586_p4), %s283_s17, 4096  }
  0x7a   : > { %1724 = vsyncadd (%p2586_p4), %s283_s17, 4294963200  ;;  %p2587_p11 = scmp.eq.s32.totalorder %s1813_s25, 0 }
  0x7c   : > { %1726 = dma.done.wait (%p2587_p11), [#allocation6], 2048   ;;  %p2588_p13 = pmov %p2587_p11 }
  0x7d   : > { %v359_v0 = vld [vmem:[#allocation7] sm:$0xff]  ;;  %v360_v1 = vld [vmem:[#allocation7 + $0x8] sm:$0xff]  ;;  %v361_v2 = vld [vmem:[#allocation7 + $0x10] sm:$0xff]  ;;  %s2376_s26 = scalar_lea.vmem [#allocation8], %s1981_s18  ;;  %s1278_s15 = sshll.u32 %s1813_s25, 12 }
  0x7e   : > { %1728 = vsyncadd (%p2588_p13), [#allocation6], 4294965248  ;;  %v1407_v3 = vpack.c.bf16 %v360_v1, %v359_v0  ;;  %v362_v4 = vld [vmem:[#allocation7 + $0x18] sm:$0xff]  ;;  %v363_v6 = vld [vmem:[#allocation7 + $0x20] sm:$0xff]  ;;  %s1148_s23 = sshll.u32 %s2376_s26, 4  ;;  %s2504_s11 = scalar_lea.hbm %s2558_s6, %s1278_s15  ;;  %s2506_s23 = int_to_ptr.vmem [resolvable:$true] %s1148_s23 }
  0x7f   : > { %v1411_v5 = vpack.c.bf16 %v362_v4, %v361_v2  ;;  %v364_v7 = vld [vmem:[#allocation7 + $0x28] sm:$0xff]  ;;  %v327_v9 = vld [vmem:[%s1985_s13] sm:$0xff]  ;;  %v365_v11 = vld [vmem:[#allocation7 + $0x30] sm:$0xff]  ;;  %s1135_s25 = scalar_lea.sflag [#allocation4], %s1978_s9  ;;  %s1673_s0 = scalar_lea.vmem %s2506_s23, 4096 }
  0x80   : > { %1408 = vmatprep.subr.bf16.mxu0 %v1407_v3  ;;  %1439 = vmatprep.subr.bf16.mxu1 %v1407_v3  ;;  %v1415_v8 = vpack.c.bf16 %v364_v7, %v363_v6  ;;  %v343_v10 = vld [vmem:[%s1985_s13 + $0x80] sm:$0xff]  ;;  %v366_v12 = vld [vmem:[#allocation7 + $0x38] sm:$0xff]  ;;  %v368_v15 = vld [vmem:[#allocation7 + $0x48] sm:$0xff]  ;;  %p1674_p3 = scmp.ne.s32.totalorder %s2506_s23, %s1673_s0  ;;  %s1754_s18 = smov [#allocation8]  }
  0x81   : > { %1410 = vmatpush3.bf16.msra.mxu0 %v1407_v3  ;;  %1447 = vmatpush3.bf16.msra.mxu1 %v1407_v3  ;;  %v1419_v13 = vpack.c.bf16 %v366_v12, %v365_v11  ;;  %v367_v14 = vld [vmem:[#allocation7 + $0x40] sm:$0xff]  ;;  %v369_v17 = vld [vmem:[#allocation7 + $0x50] sm:$0xff]  ;;  %v370_v18 = vld [vmem:[#allocation7 + $0x58] sm:$0xff]  ;;  %s1677_s19 = sshll.u32 %s1754_s18, 4  ;;  %s1678_s19 = int_to_ptr.vmem [resolvable:$false] %s1677_s19 }
  0x82   : > { %1412 = vmatprep.subr.bf16.mxu0 %v1411_v5  ;;  %1440 = vmatprep.subr.bf16.mxu1 %v1411_v5  ;;  %v1423_v16 = vpack.c.bf16 %v368_v15, %v367_v14  ;;  %v1427_v19 = vpack.c.bf16 %v370_v18, %v369_v17  ;;  %v371_v20 = vld [vmem:[#allocation7 + $0x60] sm:$0xff]  ;;  %v372_v21 = vld [vmem:[#allocation7 + $0x68] sm:$0xff]  ;;  %v373_v23 = vld [vmem:[#allocation7 + $0x70] sm:$0xff]  ;;  %p1675_p7 = pnand %p1674_p3, %p1886_p12  ;;  %p1680_p1 = scmp.lt.s32.totalorder %s2506_s23, %s1678_s19 }
  0x83   : > { %1359 = vmatprep.mubr.f32.mxu0 %v327_v9  ;;  %1383 = vmatprep.mubr.f32.mxu1 %v343_v10  ;;  %v1431_v22 = vpack.c.bf16 %v372_v21, %v371_v20  ;;  %v374_v24 = vld [vmem:[#allocation7 + $0x78] sm:$0xff]  ;;  %v328_v26 = vld [vmem:[%s1985_s13 + $0x8] sm:$0xff]  ;;  %v329_v28 = vld [vmem:[%s1985_s13 + $0x10] sm:$0xff] }
  0x84   : > { %v1435_v25 = vpack.c.bf16 %v374_v24, %v373_v23  ;;  %v344_v27 = vld [vmem:[%s1985_s13 + $0x88] sm:$0xff]  ;;  %v345_v29 = vld [vmem:[%s1985_s13 + $0x90] sm:$0xff]  ;;  %v330_v30 = vld [vmem:[%s1985_s13 + $0x18] sm:$0xff]  ;;  %p1676_p9 = pneg %p1675_p7 }
  0x85   : > { %1414 = vmatpush3.bf16.msra.mxu0 %v1411_v5  ;;  %1448 = vmatpush3.bf16.msra.mxu1 %v1411_v5  ;;  %v346_v31 = vld [vmem:[%s1985_s13 + $0x98] sm:$0xff]  ;;  %v331_v32 = vld [vmem:[%s1985_s13 + $0x20] sm:$0xff]  ;;  %v332_v34 = vld [vmem:[%s1985_s13 + $0x28] sm:$0xff] }
  0x86   : > { %1416 = vmatprep.subr.bf16.mxu0 %v1415_v8  ;;  %1441 = vmatprep.subr.bf16.mxu1 %v1415_v8  ;;  %v347_v33 = vld [vmem:[%s1985_s13 + $0xa0] sm:$0xff]  ;;  %v348_v35 = vld [vmem:[%s1985_s13 + $0xa8] sm:$0xff]  ;;  %v333_v36 = vld [vmem:[%s1985_s13 + $0x30] sm:$0xff] }
  0x87   : > { %v349_v37 = vld [vmem:[%s1985_s13 + $0xb0] sm:$0xff]  ;;  %v334_v38 = vld [vmem:[%s1985_s13 + $0x38] sm:$0xff]  ;;  %v335_v40 = vld [vmem:[%s1985_s13 + $0x40] sm:$0xff] }
  0x88   : > { %v350_v39 = vld [vmem:[%s1985_s13 + $0xb8] sm:$0xff]  ;;  %v351_v41 = vld [vmem:[%s1985_s13 + $0xc0] sm:$0xff]  ;;  %v336_v42 = vld [vmem:[%s1985_s13 + $0x48] sm:$0xff] }
  0x89   : > { %1418 = vmatpush3.bf16.msra.mxu0 %v1415_v8  ;;  %1449 = vmatpush3.bf16.msra.mxu1 %v1415_v8  ;;  %v352_v43 = vld [vmem:[%s1985_s13 + $0xc8] sm:$0xff]  ;;  %v337_v44 = vld [vmem:[%s1985_s13 + $0x50] sm:$0xff]  ;;  %v338_v46 = vld [vmem:[%s1985_s13 + $0x58] sm:$0xff] }
  0x8a   : > { %1420 = vmatprep.subr.bf16.mxu0 %v1419_v13  ;;  %1442 = vmatprep.subr.bf16.mxu1 %v1419_v13  ;;  %v353_v45 = vld [vmem:[%s1985_s13 + $0xd0] sm:$0xff]  ;;  %v354_v47 = vld [vmem:[%s1985_s13 + $0xd8] sm:$0xff]  ;;  %v339_v48 = vld [vmem:[%s1985_s13 + $0x60] sm:$0xff] }
  0x8b   : > { %v355_v49 = vld [vmem:[%s1985_s13 + $0xe0] sm:$0xff]  ;;  %v340_v50 = vld [vmem:[%s1985_s13 + $0x68] sm:$0xff]  ;;  %v341_v52 = vld [vmem:[%s1985_s13 + $0x70] sm:$0xff] }
  0x8c   : > { %v356_v51 = vld [vmem:[%s1985_s13 + $0xe8] sm:$0xff]  ;;  %v357_v53 = vld [vmem:[%s1985_s13 + $0xf0] sm:$0xff]  ;;  %v342_v54 = vld [vmem:[%s1985_s13 + $0x78] sm:$0xff] }
  0x8d   : > { %1422 = vmatpush3.bf16.msra.mxu0 %v1419_v13  ;;  %1450 = vmatpush3.bf16.msra.mxu1 %v1419_v13  ;;  %v358_v55 = vld [vmem:[%s1985_s13 + $0xf8] sm:$0xff]  ;;  %v376_v56 = vld [vmem:[%s1993_s2 + $0x8] sm:$0xff]  ;;  %v2039_v57 = vld [vmem:[%s2555_s3] ss:$0 sm:$0xff]  ;;  %s1679_s13 = scalar_lea.vmem %s1678_s19, 8192 }
  0x8e   : > { %1424 = vmatprep.subr.bf16.mxu0 %v1423_v16  ;;  %1443 = vmatprep.subr.bf16.mxu1 %v1423_v16  ;;  %v392_v58 = vld [vmem:[%s1993_s2 + $0x88] sm:$0xff]  ;;  %v415_v59 = vadd.f32 %v2039_v57, %v376_v56  ;;  %v375_v61 = vld [vmem:[%s1993_s2] sm:$0xff]  ;;  %v378_v62 = vld [vmem:[%s1993_s2 + $0x18] sm:$0xff]  ;;  %p1681_p5 = scmp.lt.s32.totalorder %s1679_s13, %s1673_s0 }
  0x8f   : > { %v431_v60 = vadd.f32 %v2039_v57, %v392_v58  ;;  %v394_v1 = vld [vmem:[%s1993_s2 + $0x98] sm:$0xff]  ;;  %v414_v4 = vadd.f32 %v2039_v57, %v375_v61  ;;  %v417_v7 = vadd.f32 %v2039_v57, %v378_v62  ;;  %v391_v8 = vld [vmem:[%s1993_s2 + $0x80] sm:$0xff]  ;;  %v377_v17 = vld [vmem:[%s1993_s2 + $0x10] sm:$0xff] }
  0x90   : > { %v433_v9 = vadd.f32 %v2039_v57, %v394_v1  ;;  %v430_v13 = vadd.f32 %v2039_v57, %v391_v8  ;;  %v393_v18 = vld [vmem:[%s1993_s2 + $0x90] sm:$0xff]  ;;  %v380_v20 = vld [vmem:[%s1993_s2 + $0x28] sm:$0xff]  ;;  %v383_v1 = vld [vmem:[%s1993_s2 + $0x40] sm:$0xff]  ;;  %p1682_p2 = por %p1681_p5, %p1680_p1 }
  0x91   : > { %1426 = vmatpush3.bf16.msra.mxu0 %v1423_v16  ;;  %1451 = vmatpush3.bf16.msra.mxu1 %v1423_v16 }
  0x92   : > { %1428 = vmatprep.subr.bf16.mxu0 %v1427_v19  ;;  %1444 = vmatprep.subr.bf16.mxu1 %v1427_v19  ;;  %p1683_p6 = pnand %p1682_p2, %p1676_p9 }
  0x95   : > { %1430 = vmatpush3.bf16.msra.mxu0 %v1427_v19  ;;  %1452 = vmatpush3.bf16.msra.mxu1 %v1427_v19 }
  0x96   : > { %1432 = vmatprep.subr.bf16.mxu0 %v1431_v22  ;;  %1445 = vmatprep.subr.bf16.mxu1 %v1431_v22 }
  0x99   : > { %1434 = vmatpush3.bf16.msra.mxu0 %v1431_v22  ;;  %1453 = vmatpush3.bf16.msra.mxu1 %v1431_v22  ;;  %v379_v22 = vld [vmem:[%s1993_s2 + $0x20] sm:$0xff] }
  0x9a   : > { %1436 = vmatprep.subr.bf16.mxu0 %v1435_v25  ;;  %1446 = vmatprep.subr.bf16.mxu1 %v1435_v25 }
  0x9d   : > { %1438 = vmatpush3.bf16.msra.mxu0 %v1435_v25  ;;  %1454 = vmatpush3.bf16.msra.mxu1 %v1435_v25  ;;  %v416_v25 = vadd.f32 %v2039_v57, %v377_v17 }
  0xa0   : > { %1360 = vmatmul.mubr.f32.vlgmr.msra.gmra.mrb[0].mxu0 %v328_v26  ;;  %1384 = vmatmul.mubr.f32.vlgmr.msra.gmra.mrb[0].mxu1 %v344_v27  ;;  %v432_v26 = vadd.f32 %v2039_v57, %v393_v18 }
  0xa1   : > { %1362 = vmatprep.mubr.f32.mxu0 %v329_v28  ;;  %1386 = vmatprep.mubr.f32.mxu1 %v345_v29  ;;  %v419_v29 = vadd.f32 %v2039_v57, %v380_v20 }
  0xa4   : > { %1363 = vmatmul.mubr.f32.gmra.mrb[2].mxu0 %v330_v30  ;;  %1387 = vmatmul.mubr.f32.gmra.mrb[2].mxu1 %v346_v31  ;;  %v418_v30 = vadd.f32 %v2039_v57, %v379_v22  ;;  %v396_v31 = vld [vmem:[%s1993_s2 + $0xa8] sm:$0xff] }
  0xa5   : > { %1365 = vmatprep.mubr.f32.mxu0 %v331_v32  ;;  %1389 = vmatprep.mubr.f32.mxu1 %v347_v33  ;;  %v395_v32 = vld [vmem:[%s1993_s2 + $0xa0] sm:$0xff] }
  0xa8   : > { %1366 = vmatmul.mubr.f32.gmra.mrb[4].mxu0 %v332_v34  ;;  %1390 = vmatmul.mubr.f32.gmra.mrb[4].mxu1 %v348_v35 }
  0xa9   : > { %1368 = vmatprep.mubr.f32.mxu0 %v333_v36  ;;  %1392 = vmatprep.mubr.f32.mxu1 %v349_v37 }
  0xac   : > { %1369 = vmatmul.mubr.f32.gmra.mrb[6].mxu0 %v334_v38  ;;  %1393 = vmatmul.mubr.f32.gmra.mrb[6].mxu1 %v350_v39  ;;  %v435_v39 = vadd.f32 %v2039_v57, %v396_v31 }
  0xad   : > { %1371 = vmatprep.mubr.f32.mxu0 %v335_v40  ;;  %1395 = vmatprep.mubr.f32.mxu1 %v351_v41 }
  0xb0   : > { %1372 = vmatmul.mubr.f32.gmra.mrb[8].mxu0 %v336_v42  ;;  %1396 = vmatmul.mubr.f32.gmra.mrb[8].mxu1 %v352_v43  ;;  %v434_v42 = vadd.f32 %v2039_v57, %v395_v32  ;;  %v382_v43 = vld [vmem:[%s1993_s2 + $0x38] sm:$0xff] }
  0xb1   : > { %1374 = vmatprep.mubr.f32.mxu0 %v337_v44  ;;  %1398 = vmatprep.mubr.f32.mxu1 %v353_v45  ;;  %v381_v44 = vld [vmem:[%s1993_s2 + $0x30] sm:$0xff]  ;;  %v402_v32 = vld [vmem:[%s1993_s2 + $0xd8] sm:$0xff] }
  0xb4   : > { %1375 = vmatmul.mubr.f32.gmra.mrb[10].mxu0 %v338_v46  ;;  %1399 = vmatmul.mubr.f32.gmra.mrb[10].mxu1 %v354_v47 }
  0xb5   : > { %1377 = vmatprep.mubr.f32.mxu0 %v339_v48  ;;  %1401 = vmatprep.mubr.f32.mxu1 %v355_v49  ;;  %v421_v49 = vadd.f32 %v2039_v57, %v382_v43  ;;  %v387_v43 = vld [vmem:[%s1993_s2 + $0x60] sm:$0xff] }
  0xb8   : > { %1378 = vmatmul.mubr.f32.gmra.mrb[12].mxu0 %v340_v50  ;;  %1402 = vmatmul.mubr.f32.gmra.mrb[12].mxu1 %v356_v51 }
  0xb9   : > { %1380 = vmatprep.mubr.f32.mxu0 %v341_v52  ;;  %1404 = vmatprep.mubr.f32.mxu1 %v357_v53  ;;  %v420_v52 = vadd.f32 %v2039_v57, %v381_v44  ;;  %v398_v53 = vld [vmem:[%s1993_s2 + $0xb8] sm:$0xff] }
  0xbc   : > { %1381 = vmatmul.mubr.f32.gmra.mrb[14].mxu0 %v342_v54  ;;  %1405 = vmatmul.mubr.f32.gmra.mrb[14].mxu1 %v358_v55  ;;  %v397_v54 = vld [vmem:[%s1993_s2 + $0xb0] sm:$0xff] }
 0x173   : > { %v1361_v63 = vpop.f32.mrb[0].mxu0  ;;  %v1385_v0 = vpop.f32.mrb[0].mxu1 }
 0x174   : > { %v2047_v2 = vadd.f32 %v1361_v63, %v415_v59  ;;  %v2049_v3 = vadd.f32 %v1385_v0, %v431_v60  ;;  %v512_v5 = vpop.f32.mrb[1].mxu0  ;;  %v592_v6 = vpop.f32.mrb[1].mxu1  ;;  %v437_v60 = vadd.f32 %v2039_v57, %v398_v53  ;;  %v436_v63 = vadd.f32 %v2039_v57, %v397_v54  ;;  %v384_v0 = vld [vmem:[%s1993_s2 + $0x48] sm:$0xff] }
 0x175   : > { %v2057_v12 = vadd.f32 %v512_v5, %v414_v4  ;;  %v2070_v24 = vadd.f32 %v592_v6, %v430_v13  ;;  %v423_v8 = vadd.f32 %v2039_v57, %v384_v0  ;;  %v400_v13 = vld [vmem:[%s1993_s2 + $0xc8] sm:$0xff] }
 0x176   : > { %705 = vadd.xlane.f32.xlu1 %v2049_v3  ;;  %673 = vadd.xlane.f32.xlu0 %v2047_v2 }
 0x177   : > { %v1364_v10 = vpop.f32.mrb[2].mxu0  ;;  %v1388_v11 = vpop.f32.mrb[2].mxu1 }
 0x178   : > { %v2060_v14 = vadd.f32 %v1364_v10, %v417_v7  ;;  %v522_v15 = vpop.f32.mrb[3].mxu0  ;;  %v602_v16 = vpop.f32.mrb[3].mxu1  ;;  %v2064_v19 = vadd.f32 %v1388_v11, %v433_v9  ;;  %v422_v11 = vadd.f32 %v2039_v57, %v383_v1  ;;  %v406_v1 = vld [vmem:[%s1993_s2 + $0xf8] sm:$0xff] }
 0x179   : > { %v2080_v35 = vadd.f32 %v522_v15, %v416_v25  ;;  %v2082_v36 = vadd.f32 %v602_v16, %v432_v26  ;;  %v399_v15 = vld [vmem:[%s1993_s2 + $0xc0] sm:$0xff]  ;;  %v386_v26 = vld [vmem:[%s1993_s2 + $0x58] sm:$0xff] }
 0x17a   : > { %677 = vadd.xlane.f32.xlu1 %v2060_v14  ;;  %671 = vadd.xlane.f32.xlu0 %v2057_v12  ;;  %v438_v25 = vadd.f32 %v2039_v57, %v399_v15 }
 0x17b   : > { %v1367_v21 = vpop.f32.mrb[4].mxu0  ;;  %v1391_v23 = vpop.f32.mrb[4].mxu1 }
 0x17c   : > { %v532_v27 = vpop.f32.mrb[5].mxu0  ;;  %v612_v28 = vpop.f32.mrb[5].mxu1  ;;  %v2085_v40 = vadd.f32 %v1367_v21, %v419_v29  ;;  %v2095_v50 = vadd.f32 %v1391_v23, %v435_v39  ;;  %v439_v21 = vadd.f32 %v2039_v57, %v400_v13 }
 0x17d   : > { %v2089_v41 = vadd.f32 %v532_v27, %v418_v30  ;;  %v2099_v51 = vadd.f32 %v612_v28, %v434_v42  ;;  %v385_v27 = vld [vmem:[%s1993_s2 + $0x50] sm:$0xff]  ;;  %v425_v28 = vadd.f32 %v2039_v57, %v386_v26  ;;  %v388_v42 = vld [vmem:[%s1993_s2 + $0x68] sm:$0xff] }
 0x17e   : > { %709 = vadd.xlane.f32.xlu1 %v2064_v19  ;;  %703 = vadd.xlane.f32.xlu0 %v2070_v24  ;;  %v424_v31 = vadd.f32 %v2039_v57, %v385_v27  ;;  %v427_v44 = vadd.f32 %v2039_v57, %v388_v42 }
 0x17f   : > { %v1370_v33 = vpop.f32.mrb[6].mxu0  ;;  %v1394_v34 = vpop.f32.mrb[6].mxu1 }
 0x180   : > { %v542_v37 = vpop.f32.mrb[7].mxu0  ;;  %v622_v38 = vpop.f32.mrb[7].mxu1  ;;  %v2105_v61 = vadd.f32 %v1370_v33, %v421_v49  ;;  %v2115_v9 = vadd.f32 %v1394_v34, %v437_v60  ;;  %v401_v33 = vld [vmem:[%s1993_s2 + $0xd0] sm:$0xff]  ;;  %v441_v34 = vadd.f32 %v2039_v57, %v402_v32  ;;  %v403_v49 = vld [vmem:[%s1993_s2 + $0xe0] sm:$0xff] }
 0x181   : > { %v2109_v62 = vadd.f32 %v542_v37, %v420_v52  ;;  %v2119_v10 = vadd.f32 %v622_v38, %v436_v63  ;;  %v440_v39 = vadd.f32 %v2039_v57, %v401_v33 }
 0x182   : > { %675 = vadd.xlane.f32.xlu1 %v2080_v35  ;;  %707 = vadd.xlane.f32.xlu0 %v2082_v36 }
 0x183   : > { %v1373_v45 = vpop.f32.mrb[8].mxu0  ;;  %v1397_v46 = vpop.f32.mrb[8].mxu1 }
 0x184   : > { %v552_v47 = vpop.f32.mrb[9].mxu0  ;;  %v632_v48 = vpop.f32.mrb[9].mxu1  ;;  %v2125_v22 = vadd.f32 %v1373_v45, %v423_v8  ;;  %v2135_v29 = vadd.f32 %v1397_v46, %v439_v21 }
 0x185   : > { %v2129_v23 = vadd.f32 %v552_v47, %v422_v11  ;;  %v2139_v30 = vadd.f32 %v632_v48, %v438_v25  ;;  %v426_v47 = vadd.f32 %v2039_v57, %v387_v43  ;;  %v404_v48 = vld [vmem:[%s1993_s2 + $0xe8] sm:$0xff] }
 0x186   : > { %681 = vadd.xlane.f32.xlu1 %v2085_v40  ;;  %679 = vadd.xlane.f32.xlu0 %v2089_v41  ;;  %v443_v52 = vadd.f32 %v2039_v57, %v404_v48 }
 0x187   : > { %v1376_v55 = vpop.f32.mrb[10].mxu0  ;;  %v1400_v56 = vpop.f32.mrb[10].mxu1 }
 0x188   : > { %v562_v58 = vpop.f32.mrb[11].mxu0  ;;  %v642_v59 = vpop.f32.mrb[11].mxu1  ;;  %v2145_v37 = vadd.f32 %v1376_v55, %v425_v28  ;;  %v2155_v45 = vadd.f32 %v1400_v56, %v441_v34  ;;  %v442_v55 = vadd.f32 %v2039_v57, %v403_v49  ;;  %v390_v56 = vld [vmem:[%s1993_s2 + $0x78] sm:$0xff] }
 0x189   : > { %v2149_v38 = vadd.f32 %v562_v58, %v424_v31  ;;  %v2159_v46 = vadd.f32 %v642_v59, %v440_v39  ;;  %v389_v58 = vld [vmem:[%s1993_s2 + $0x70] sm:$0xff]  ;;  %v429_v59 = vadd.f32 %v2039_v57, %v390_v56 }
 0x18a   : > { %713 = vadd.xlane.f32.xlu1 %v2095_v50  ;;  %711 = vadd.xlane.f32.xlu0 %v2099_v51  ;;  %v428_v0 = vadd.f32 %v2039_v57, %v389_v58 }
 0x18b   : > { %v1379_v4 = vpop.f32.mrb[12].mxu0  ;;  %v1403_v5 = vpop.f32.mrb[12].mxu1 }
 0x18c   : > { %v572_v6 = vpop.f32.mrb[13].mxu0  ;;  %v652_v7 = vpop.f32.mrb[13].mxu1  ;;  %v2165_v53 = vadd.f32 %v1379_v4, %v427_v44  ;;  %v2175_v60 = vadd.f32 %v1403_v5, %v443_v52  ;;  %v405_v4 = vld [vmem:[%s1993_s2 + $0xf0] sm:$0xff] }
 0x18d   : > { %v2169_v54 = vadd.f32 %v572_v6, %v426_v47  ;;  %v2179_v63 = vadd.f32 %v652_v7, %v442_v55  ;;  %v445_v6 = vadd.f32 %v2039_v57, %v406_v1  ;;  %v444_v11 = vadd.f32 %v2039_v57, %v405_v4 }
 0x18e   : > { %685 = vadd.xlane.f32.xlu1 %v2105_v61  ;;  %683 = vadd.xlane.f32.xlu0 %v2109_v62 }
 0x18f   : > { %v1382_v16 = vpop.f32.mrb[14].mxu0  ;;  %v1406_v17 = vpop.f32.mrb[14].mxu1 }
 0x190   : > { %v582_v18 = vpop.f32.mrb[15].mxu0  ;;  %v662_v20 = vpop.f32.mrb[15].mxu1  ;;  %v2185_v8 = vadd.f32 %v1382_v16, %v429_v59  ;;  %v2192_v13 = vadd.f32 %v1406_v17, %v445_v6 }
 0x191   : > { %v2189_v5 = vadd.f32 %v582_v18, %v428_v0  ;;  %v2196_v7 = vadd.f32 %v662_v20, %v444_v11 }
 0x192   : > { %717 = vadd.xlane.f32.xlu1 %v2115_v9  ;;  %715 = vadd.xlane.f32.xlu0 %v2119_v10 }
 0x196   : > { %689 = vadd.xlane.f32.xlu1 %v2125_v22  ;;  %687 = vadd.xlane.f32.xlu0 %v2129_v23 }
 0x19a   : > { %721 = vadd.xlane.f32.xlu1 %v2135_v29  ;;  %719 = vadd.xlane.f32.xlu0 %v2139_v30 }
 0x19e   : > { %693 = vadd.xlane.f32.xlu1 %v2145_v37  ;;  %691 = vadd.xlane.f32.xlu0 %v2149_v38 }
 0x1a2   : > { %725 = vadd.xlane.f32.xlu1 %v2155_v45  ;;  %723 = vadd.xlane.f32.xlu0 %v2159_v46 }
 0x1a6   : > { %697 = vadd.xlane.f32.xlu1 %v2165_v53  ;;  %695 = vadd.xlane.f32.xlu0 %v2169_v54 }
 0x1aa   : > { %729 = vadd.xlane.f32.xlu1 %v2175_v60  ;;  %727 = vadd.xlane.f32.xlu0 %v2179_v63 }
 0x1ae   : > { %701 = vadd.xlane.f32.xlu1 %v2185_v8  ;;  %699 = vadd.xlane.f32.xlu0 %v2189_v5 }
 0x1b2   : > { %733 = vadd.xlane.f32.xlu1 %v2192_v13  ;;  %731 = vadd.xlane.f32.xlu0 %v2196_v7 }
 0x203   : > { %v706_v15 = vpop.xlane.xlu1 %705  ;;  %v674_v16 = vpop.xlane.xlu0 %673 }
 0x204   : > { %v753_v21 = vmul.f32 0.0078125, %v706_v15  ;;  %v737_v25 = vmul.f32 0.0078125, %v674_v16 }
 0x206   : > { %v2201_v18 = vsub.f32 %v2047_v2, %v737_v25  ;;  %v2204_v26 = vsub.f32 %v2049_v3, %v753_v21 }
 0x207   : > { %v678_v57 = vpop.xlane.xlu1 %677  ;;  %v672_v17 = vpop.xlane.xlu0 %671 }
 0x208   : > { %v739_v27 = vmul.f32 0.0078125, %v678_v57  ;;  %v736_v28 = vmul.f32 0.0078125, %v672_v17  ;;  %v801_v20 = vmul.f32 %v2201_v18, %v2201_v18  ;;  %v817_v3 = vmul.f32 %v2204_v26, %v2204_v26 }
 0x20a   : > { %v2209_v31 = vsub.f32 %v2057_v12, %v736_v28  ;;  %834 = vadd.xlane.f32.xlu1 %v801_v20  ;;  %v2212_v32 = vsub.f32 %v2060_v14, %v739_v27 }
 0x20b   : > { %v710_v33 = vpop.xlane.xlu1 %709  ;;  %v704_v2 = vpop.xlane.xlu0 %703 }
 0x20c   : > { %v755_v34 = vmul.f32 0.0078125, %v710_v33  ;;  %v752_v39 = vmul.f32 0.0078125, %v704_v2  ;;  %v800_v42 = vmul.f32 %v2209_v31, %v2209_v31  ;;  %v803_v14 = vmul.f32 %v2212_v32, %v2212_v32 }
 0x20e   : > { %v2219_v43 = vsub.f32 %v2070_v24, %v752_v39  ;;  %866 = vadd.xlane.f32.xlu1 %v817_v3  ;;  %832 = vadd.xlane.f32.xlu0 %v800_v42  ;;  %v2224_v47 = vsub.f32 %v2064_v19, %v755_v34 }
 0x20f   : > { %v676_v12 = vpop.xlane.xlu1 %675  ;;  %v708_v44 = vpop.xlane.xlu0 %707 }
 0x210   : > { %v738_v48 = vmul.f32 0.0078125, %v676_v12  ;;  %v754_v49 = vmul.f32 0.0078125, %v708_v44  ;;  %v816_v52 = vmul.f32 %v2219_v43, %v2219_v43  ;;  %v819_v19 = vmul.f32 %v2224_v47, %v2224_v47 }
 0x212   : > { %v2229_v55 = vsub.f32 %v2080_v35, %v738_v48  ;;  %838 = vadd.xlane.f32.xlu1 %v803_v14  ;;  %864 = vadd.xlane.f32.xlu0 %v816_v52  ;;  %v2232_v24 = vsub.f32 %v2082_v36, %v754_v49 }
 0x213   : > { %v682_v56 = vpop.xlane.xlu1 %681  ;;  %v680_v58 = vpop.xlane.xlu0 %679 }
 0x214   : > { %v741_v59 = vmul.f32 0.0078125, %v682_v56  ;;  %v740_v0 = vmul.f32 0.0078125, %v680_v58  ;;  %v802_v1 = vmul.f32 %v2229_v55, %v2229_v55  ;;  %v818_v36 = vmul.f32 %v2232_v24, %v2232_v24 }
 0x216   : > { %v2239_v4 = vsub.f32 %v2085_v40, %v741_v59  ;;  %870 = vadd.xlane.f32.xlu1 %v819_v19  ;;  %836 = vadd.xlane.f32.xlu0 %v802_v1  ;;  %v2244_v11 = vsub.f32 %v2089_v41, %v740_v0 }
 0x217   : > { %v714_v35 = vpop.xlane.xlu1 %713  ;;  %v712_v6 = vpop.xlane.xlu0 %711 }
 0x218   : > { %v757_v15 = vmul.f32 0.0078125, %v714_v35  ;;  %v756_v16 = vmul.f32 0.0078125, %v712_v6  ;;  %v805_v21 = vmul.f32 %v2239_v4, %v2239_v4  ;;  %v804_v20 = vmul.f32 %v2244_v11, %v2244_v11 }
 0x21a   : > { %v2249_v25 = vsub.f32 %v2095_v50, %v757_v15  ;;  %842 = vadd.xlane.f32.xlu1 %v805_v21  ;;  %868 = vadd.xlane.f32.xlu0 %v818_v36  ;;  %v2252_v40 = vsub.f32 %v2099_v51, %v756_v16 }
 0x21b   : > { %v686_v57 = vpop.xlane.xlu1 %685  ;;  %v684_v17 = vpop.xlane.xlu0 %683 }
 0x21c   : > { %v743_v27 = vmul.f32 0.0078125, %v686_v57  ;;  %v742_v28 = vmul.f32 0.0078125, %v684_v17  ;;  %v821_v41 = vmul.f32 %v2249_v25, %v2249_v25  ;;  %v820_v51 = vmul.f32 %v2252_v40, %v2252_v40 }
 0x21e   : > { %v2259_v33 = vsub.f32 %v2105_v61, %v743_v27  ;;  %874 = vadd.xlane.f32.xlu1 %v821_v41  ;;  %840 = vadd.xlane.f32.xlu0 %v804_v20  ;;  %v2264_v34 = vsub.f32 %v2109_v62, %v742_v28 }
 0x21f   : > { %v718_v50 = vpop.xlane.xlu1 %717  ;;  %v716_v2 = vpop.xlane.xlu0 %715 }
 0x220   : > { %v759_v39 = vmul.f32 0.0078125, %v718_v50  ;;  %v758_v3 = vmul.f32 0.0078125, %v716_v2  ;;  %v807_v42 = vmul.f32 %v2259_v33, %v2259_v33  ;;  %v806_v52 = vmul.f32 %v2264_v34, %v2264_v34 }
 0x222   : > { %v2269_v12 = vsub.f32 %v2115_v9, %v759_v39  ;;  %846 = vadd.xlane.f32.xlu1 %v807_v42  ;;  %872 = vadd.xlane.f32.xlu0 %v820_v51  ;;  %v2272_v61 = vsub.f32 %v2119_v10, %v758_v3 }
 0x223   : > { %v690_v44 = vpop.xlane.xlu1 %689  ;;  %v688_v14 = vpop.xlane.xlu0 %687 }
 0x224   : > { %v745_v48 = vmul.f32 0.0078125, %v690_v44  ;;  %v744_v49 = vmul.f32 0.0078125, %v688_v14  ;;  %v823_v62 = vmul.f32 %v2269_v12, %v2269_v12  ;;  %v822_v10 = vmul.f32 %v2272_v61, %v2272_v61 }
 0x226   : > { %v2279_v56 = vsub.f32 %v2125_v22, %v745_v48  ;;  %878 = vadd.xlane.f32.xlu1 %v823_v62  ;;  %844 = vadd.xlane.f32.xlu0 %v806_v52  ;;  %v2284_v59 = vsub.f32 %v2129_v23, %v744_v49 }
 0x227   : > { %v722_v9 = vpop.xlane.xlu1 %721  ;;  %v720_v58 = vpop.xlane.xlu0 %719 }
 0x228   : > { %v761_v0 = vmul.f32 0.0078125, %v722_v9  ;;  %v760_v19 = vmul.f32 0.0078125, %v720_v58  ;;  %v809_v1 = vmul.f32 %v2279_v56, %v2279_v56  ;;  %v808_v21 = vmul.f32 %v2284_v59, %v2284_v59 }
 0x22a   : > { %v2289_v35 = vsub.f32 %v2135_v29, %v761_v0  ;;  %850 = vadd.xlane.f32.xlu1 %v809_v1  ;;  %876 = vadd.xlane.f32.xlu0 %v822_v10  ;;  %v2292_v22 = vsub.f32 %v2139_v30, %v760_v19 }
 0x22b   : > { %v694_v6 = vpop.xlane.xlu1 %693  ;;  %v692_v36 = vpop.xlane.xlu0 %691 }
 0x22c   : > { %v747_v15 = vmul.f32 0.0078125, %v694_v6  ;;  %v746_v16 = vmul.f32 0.0078125, %v692_v36  ;;  %v825_v23 = vmul.f32 %v2289_v35, %v2289_v35  ;;  %v824_v30 = vmul.f32 %v2292_v22, %v2292_v22 }
 0x22e   : > { %v2299_v57 = vsub.f32 %v2145_v37, %v747_v15  ;;  %882 = vadd.xlane.f32.xlu1 %v825_v23  ;;  %848 = vadd.xlane.f32.xlu0 %v808_v21  ;;  %v2304_v27 = vsub.f32 %v2149_v38, %v746_v16 }
 0x22f   : > { %v726_v29 = vpop.xlane.xlu1 %725  ;;  %v724_v17 = vpop.xlane.xlu0 %723 }
 0x230   : > { %v763_v28 = vmul.f32 0.0078125, %v726_v29  ;;  %v762_v41 = vmul.f32 0.0078125, %v724_v17  ;;  %v811_v20 = vmul.f32 %v2299_v57, %v2299_v57  ;;  %v810_v42 = vmul.f32 %v2304_v27, %v2304_v27 }
 0x232   : > { %v2309_v50 = vsub.f32 %v2155_v45, %v763_v28  ;;  %854 = vadd.xlane.f32.xlu1 %v811_v20  ;;  %880 = vadd.xlane.f32.xlu0 %v824_v30  ;;  %v2312_v37 = vsub.f32 %v2159_v46, %v762_v41 }
 0x233   : > { %v698_v2 = vpop.xlane.xlu1 %697  ;;  %v696_v51 = vpop.xlane.xlu0 %695 }
 0x234   : > { %v749_v39 = vmul.f32 0.0078125, %v698_v2  ;;  %v748_v3 = vmul.f32 0.0078125, %v696_v51  ;;  %v827_v38 = vmul.f32 %v2309_v50, %v2309_v50  ;;  %v826_v46 = vmul.f32 %v2312_v37, %v2312_v37 }
 0x236   : > { %v2319_v44 = vsub.f32 %v2165_v53, %v749_v39  ;;  %886 = vadd.xlane.f32.xlu1 %v827_v38  ;;  %852 = vadd.xlane.f32.xlu0 %v810_v42  ;;  %v2324_v48 = vsub.f32 %v2169_v54, %v748_v3 }
 0x237   : > { %v730_v45 = vpop.xlane.xlu1 %729  ;;  %v728_v14 = vpop.xlane.xlu0 %727 }
 0x238   : > { %v765_v49 = vmul.f32 0.0078125, %v730_v45  ;;  %v764_v62 = vmul.f32 0.0078125, %v728_v14  ;;  %v813_v52 = vmul.f32 %v2319_v44, %v2319_v44  ;;  %v812_v1 = vmul.f32 %v2324_v48, %v2324_v48 }
 0x23a   : > { %v2329_v9 = vsub.f32 %v2175_v60, %v765_v49  ;;  %858 = vadd.xlane.f32.xlu1 %v813_v52  ;;  %884 = vadd.xlane.f32.xlu0 %v826_v46  ;;  %v2332_v53 = vsub.f32 %v2179_v63, %v764_v62 }
 0x23b   : > { %v702_v58 = vpop.xlane.xlu1 %701  ;;  %v700_v10 = vpop.xlane.xlu0 %699 }
 0x23c   : > { %v751_v0 = vmul.f32 0.0078125, %v702_v58  ;;  %v750_v19 = vmul.f32 0.0078125, %v700_v10  ;;  %v829_v54 = vmul.f32 %v2329_v9, %v2329_v9  ;;  %v828_v63 = vmul.f32 %v2332_v53, %v2332_v53 }
 0x23e   : > { %v2339_v6 = vsub.f32 %v2185_v8, %v751_v0  ;;  %890 = vadd.xlane.f32.xlu1 %v829_v54  ;;  %856 = vadd.xlane.f32.xlu0 %v812_v1  ;;  %v2344_v15 = vsub.f32 %v2189_v5, %v750_v19  ;;  %v2363_v19 = vld [vmem:[%s2556_s4] ss:$0 sm:$0xff] }
 0x23f   : > { %v734_v60 = vpop.xlane.xlu1 %733  ;;  %v732_v36 = vpop.xlane.xlu0 %731 }
 0x240   : > { %v767_v16 = vmul.f32 0.0078125, %v734_v60  ;;  %v766_v23 = vmul.f32 0.0078125, %v732_v36  ;;  %v815_v21 = vmul.f32 %v2339_v6, %v2339_v6  ;;  %v814_v5 = vmul.f32 %v2344_v15, %v2344_v15 }
 0x242   : > { %v2349_v29 = vsub.f32 %v2192_v13, %v767_v16  ;;  %862 = vadd.xlane.f32.xlu1 %v815_v21  ;;  %888 = vadd.xlane.f32.xlu0 %v828_v63  ;;  %v2352_v8 = vsub.f32 %v2196_v7, %v766_v23  ;;  %v2369_v16 = vld [vmem:[%s2557_s5] ss:$0 sm:$0xff] }
 0x244   : > { %v831_v17 = vmul.f32 %v2349_v29, %v2349_v29  ;;  %v830_v30 = vmul.f32 %v2352_v8, %v2352_v8 }
 0x246   : > { %894 = vadd.xlane.f32.xlu1 %v831_v17  ;;  %860 = vadd.xlane.f32.xlu0 %v814_v5 }
 0x24a   : > { %892 = vadd.xlane.f32.xlu0 %v830_v30 }
 0x297   : > { %v835_v28 = vpop.xlane.xlu1 %834 }
 0x298   : > { %v897_v13 = vmul.f32 0.0078125, %v835_v28 }
 0x29a   : > { %v929_v41 = vadd.f32 1e-12, %v897_v13 }
 0x29b   : > { %v867_v20 = vpop.xlane.xlu1 %866  ;;  %v833_v2 = vpop.xlane.xlu0 %832 }
 0x29c   : > { %1521 = vrsqrt.f32 %v929_v41  ;;  %v913_v7 = vmul.f32 0.0078125, %v867_v20  ;;  %v896_v51 = vmul.f32 0.0078125, %v833_v2 }
 0x29e   : > { %v945_v39 = vadd.f32 1e-12, %v913_v7  ;;  %v928_v3 = vadd.f32 1e-12, %v896_v51 }
 0x29f   : > { %v839_v38 = vpop.xlane.xlu1 %838  ;;  %v865_v42 = vpop.xlane.xlu0 %864 }
 0x2a0   : > { %1523 = vrsqrt.f32 %v945_v39  ;;  %v899_v45 = vmul.f32 0.0078125, %v839_v38  ;;  %v912_v14 = vmul.f32 0.0078125, %v865_v42 }
 0x2a1   : > { %1525 = vrsqrt.f32 %v928_v3 }
 0x2a2   : > { %v931_v46 = vadd.f32 1e-12, %v899_v45  ;;  %v944_v49 = vadd.f32 1e-12, %v912_v14 }
 0x2a3   : > { %v871_v62 = vpop.xlane.xlu1 %870  ;;  %v837_v52 = vpop.xlane.xlu0 %836 }
 0x2a4   : > { %1527 = vrsqrt.f32 %v931_v46  ;;  %v915_v58 = vmul.f32 0.0078125, %v871_v62  ;;  %v898_v10 = vmul.f32 0.0078125, %v837_v52 }
 0x2a5   : > { %1529 = vrsqrt.f32 %v944_v49 }
 0x2a6   : > { %v1522_v0 = vpop.eup %1521  ;;  %v947_v54 = vadd.f32 1e-12, %v915_v58  ;;  %v930_v1 = vadd.f32 1e-12, %v898_v10 }
 0x2a7   : > { %v993_v60 = vmul.f32 %v1522_v0, %v2201_v18  ;;  %v843_v36 = vpop.xlane.xlu1 %842  ;;  %v869_v63 = vpop.xlane.xlu0 %868 }
 0x2a8   : > { %1531 = vrsqrt.f32 %v947_v54  ;;  %v901_v23 = vmul.f32 0.0078125, %v843_v36  ;;  %v914_v21 = vmul.f32 0.0078125, %v869_v63 }
 0x2a9   : > { %v1032_v17 = vmul.f32 %v2363_v19, %v993_v60  ;;  %1533 = vrsqrt.f32 %v930_v1 }
 0x2aa   : > { %v1524_v5 = vpop.eup %1523  ;;  %v933_v30 = vadd.f32 1e-12, %v901_v23  ;;  %v946_v28 = vadd.f32 1e-12, %v914_v21 }
 0x2ab   : > { %v1526_v13 = vpop.eup %1525  ;;  %v1071_v18 = vadd.f32 %v2369_v16, %v1032_v17  ;;  %v1009_v41 = vmul.f32 %v1524_v5, %v2204_v26  ;;  %v875_v20 = vpop.xlane.xlu1 %874 }
 0x2ac   : > { %v841_v2 = vpop.xlane.xlu0 %840  ;;  %v992_v7 = vmul.f32 %v1526_v13, %v2209_v31  ;;  %1535 = vrsqrt.f32 %v933_v30  ;;  %v917_v51 = vmul.f32 0.0078125, %v875_v20 }
 0x2ad   : > { %v900_v39 = vmul.f32 0.0078125, %v841_v2  ;;  %1103 = vst [vmem:[%s2376_s26 + $0x8] sm:$0xff] %v1071_v18  ;;  %v1048_v3 = vmul.f32 %v2363_v19, %v1009_v41  ;;  %1537 = vrsqrt.f32 %v946_v28 }
 0x2ae   : > { %v1528_v38 = vpop.eup %1527  ;;  %v1031_v42 = vmul.f32 %v2363_v19, %v992_v7  ;;  %v949_v45 = vadd.f32 1e-12, %v917_v51 }
 0x2af   : > { %v932_v26 = vadd.f32 1e-12, %v900_v39  ;;  %v1530_v14 = vpop.eup %1529  ;;  %v1087_v31 = vadd.f32 %v2369_v16, %v1048_v3  ;;  %v995_v46 = vmul.f32 %v1528_v38, %v2212_v32  ;;  %v847_v49 = vpop.xlane.xlu1 %846 }
 0x2b0   : > { %v873_v62 = vpop.xlane.xlu0 %872  ;;  %v1070_v52 = vadd.f32 %v2369_v16, %v1031_v42  ;;  %v1008_v58 = vmul.f32 %v1530_v14, %v2219_v43  ;;  %1539 = vrsqrt.f32 %v949_v45  ;;  %v903_v10 = vmul.f32 0.0078125, %v847_v49 }
 0x2b1   : > { %1119 = vst [vmem:[%s2376_s26 + $0x88] sm:$0xff] %v1087_v31  ;;  %v1034_v0 = vmul.f32 %v2363_v19, %v995_v46  ;;  %1541 = vrsqrt.f32 %v932_v26  ;;  %v916_v54 = vmul.f32 0.0078125, %v873_v62 }
 0x2b2   : > { %v1532_v1 = vpop.eup %1531  ;;  %1102 = vst [vmem:[%s2376_s26] sm:$0xff] %v1070_v52  ;;  %v1047_v60 = vmul.f32 %v2363_v19, %v1008_v58  ;;  %v935_v36 = vadd.f32 1e-12, %v903_v10 }
 0x2b3   : > { %v1534_v32 = vpop.eup %1533  ;;  %v1073_v63 = vadd.f32 %v2369_v16, %v1034_v0  ;;  %v1011_v23 = vmul.f32 %v1532_v1, %v2224_v47  ;;  %v948_v43 = vadd.f32 1e-12, %v916_v54  ;;  %v879_v21 = vpop.xlane.xlu1 %878 }
 0x2b4   : > { %v845_v17 = vpop.xlane.xlu0 %844  ;;  %v1086_v5 = vadd.f32 %v2369_v16, %v1047_v60  ;;  %v994_v30 = vmul.f32 %v1534_v32, %v2229_v55  ;;  %1543 = vrsqrt.f32 %v935_v36  ;;  %v919_v28 = vmul.f32 0.0078125, %v879_v21 }
 0x2b5   : > { %1105 = vst [vmem:[%s2376_s26 + $0x18] sm:$0xff] %v1073_v63  ;;  %v1050_v13 = vmul.f32 %v2363_v19, %v1011_v23  ;;  %1545 = vrsqrt.f32 %v948_v43  ;;  %v902_v18 = vmul.f32 0.0078125, %v845_v17 }
 0x2b6   : > { %v1536_v41 = vpop.eup %1535  ;;  %1118 = vst [vmem:[%s2376_s26 + $0x80] sm:$0xff] %v1086_v5  ;;  %v1033_v20 = vmul.f32 %v2363_v19, %v994_v30  ;;  %v951_v47 = vadd.f32 1e-12, %v919_v28 }
 0x2b7   : > { %v1538_v2 = vpop.eup %1537  ;;  %v1089_v7 = vadd.f32 %v2369_v16, %v1050_v13  ;;  %v997_v51 = vmul.f32 %v1536_v41, %v2239_v4  ;;  %v934_v55 = vadd.f32 1e-12, %v902_v18  ;;  %v851_v39 = vpop.xlane.xlu1 %850 }
 0x2b8   : > { %v877_v3 = vpop.xlane.xlu0 %876  ;;  %v1072_v38 = vadd.f32 %v2369_v16, %v1033_v20  ;;  %v1010_v42 = vmul.f32 %v1538_v2, %v2232_v24  ;;  %1547 = vrsqrt.f32 %v951_v47  ;;  %v905_v45 = vmul.f32 0.0078125, %v851_v39 }
 0x2b9   : > { %1121 = vst [vmem:[%s2376_s26 + $0x98] sm:$0xff] %v1089_v7  ;;  %v1036_v26 = vmul.f32 %v2363_v19, %v997_v51  ;;  %1549 = vrsqrt.f32 %v934_v55  ;;  %v918_v14 = vmul.f32 0.0078125, %v877_v3 }
 0x2ba   : > { %v1540_v31 = vpop.eup %1539  ;;  %1104 = vst [vmem:[%s2376_s26 + $0x10] sm:$0xff] %v1072_v38  ;;  %v1049_v46 = vmul.f32 %v2363_v19, %v1010_v42  ;;  %v937_v4 = vadd.f32 1e-12, %v905_v45 }
 0x2bb   : > { %v1542_v49 = vpop.eup %1541  ;;  %v1075_v62 = vadd.f32 %v2369_v16, %v1036_v26  ;;  %v1013_v52 = vmul.f32 %v1540_v31, %v2249_v25  ;;  %v950_v24 = vadd.f32 1e-12, %v918_v14  ;;  %v883_v58 = vpop.xlane.xlu1 %882 }
 0x2bc   : > { %v849_v10 = vpop.xlane.xlu0 %848  ;;  %v1088_v0 = vadd.f32 %v2369_v16, %v1049_v46  ;;  %v996_v54 = vmul.f32 %v1542_v49, %v2244_v11  ;;  %1551 = vrsqrt.f32 %v937_v4  ;;  %v921_v1 = vmul.f32 0.0078125, %v883_v58 }
 0x2bd   : > { %1107 = vst [vmem:[%s2376_s26 + $0x28] sm:$0xff] %v1075_v62  ;;  %v1052_v60 = vmul.f32 %v2363_v19, %v1013_v52  ;;  %1553 = vrsqrt.f32 %v950_v24  ;;  %v904_v36 = vmul.f32 0.0078125, %v849_v10 }
 0x2be   : > { %v1544_v32 = vpop.eup %1543  ;;  %1120 = vst [vmem:[%s2376_s26 + $0x90] sm:$0xff] %v1088_v0  ;;  %v1035_v63 = vmul.f32 %v2363_v19, %v996_v54  ;;  %v953_v25 = vadd.f32 1e-12, %v921_v1 }
 0x2bf   : > { %v1546_v23 = vpop.eup %1545  ;;  %v1091_v43 = vadd.f32 %v2369_v16, %v1052_v60  ;;  %v999_v21 = vmul.f32 %v1544_v32, %v2259_v33  ;;  %v936_v11 = vadd.f32 1e-12, %v904_v36  ;;  %v855_v17 = vpop.xlane.xlu1 %854 }
 0x2c0   : > { %v881_v5 = vpop.xlane.xlu0 %880  ;;  %v1074_v30 = vadd.f32 %v2369_v16, %v1035_v63  ;;  %v1012_v28 = vmul.f32 %v1546_v23, %v2252_v40  ;;  %1555 = vrsqrt.f32 %v953_v25  ;;  %v907_v13 = vmul.f32 0.0078125, %v855_v17 }
 0x2c1   : > { %1123 = vst [vmem:[%s2376_s26 + $0xa8] sm:$0xff] %v1091_v43  ;;  %v1038_v18 = vmul.f32 %v2363_v19, %v999_v21  ;;  %1557 = vrsqrt.f32 %v936_v11  ;;  %v920_v41 = vmul.f32 0.0078125, %v881_v5 }
 0x2c2   : > { %v1548_v20 = vpop.eup %1547  ;;  %1106 = vst [vmem:[%s2376_s26 + $0x20] sm:$0xff] %v1074_v30  ;;  %v1051_v47 = vmul.f32 %v2363_v19, %v1012_v28  ;;  %v939_v33 = vadd.f32 1e-12, %v907_v13 }
 0x2c3   : > { %v1550_v2 = vpop.eup %1549  ;;  %v1077_v7 = vadd.f32 %v2369_v16, %v1038_v18  ;;  %v1015_v51 = vmul.f32 %v1548_v20, %v2269_v12  ;;  %v952_v40 = vadd.f32 1e-12, %v920_v41  ;;  %v887_v55 = vpop.xlane.xlu1 %886 }
 0x2c4   : > { %v853_v39 = vpop.xlane.xlu0 %852  ;;  %v1090_v3 = vadd.f32 %v2369_v16, %v1051_v47  ;;  %v998_v38 = vmul.f32 %v1550_v2, %v2264_v34  ;;  %1559 = vrsqrt.f32 %v939_v33  ;;  %v923_v42 = vmul.f32 0.0078125, %v887_v55 }
 0x2c5   : > { %1109 = vst [vmem:[%s2376_s26 + $0x38] sm:$0xff] %v1077_v7  ;;  %v1054_v45 = vmul.f32 %v2363_v19, %v1015_v51  ;;  %1561 = vrsqrt.f32 %v952_v40  ;;  %v906_v26 = vmul.f32 0.0078125, %v853_v39 }
 0x2c6   : > { %v1552_v14 = vpop.eup %1551  ;;  %1122 = vst [vmem:[%s2376_s26 + $0xa0] sm:$0xff] %v1090_v3  ;;  %v1037_v31 = vmul.f32 %v2363_v19, %v998_v38  ;;  %v955_v12 = vadd.f32 1e-12, %v923_v42 }
 0x2c7   : > { %v1554_v46 = vpop.eup %1553  ;;  %v1093_v4 = vadd.f32 %v2369_v16, %v1054_v45  ;;  %v1001_v49 = vmul.f32 %v1552_v14, %v2279_v56  ;;  %v938_v34 = vadd.f32 1e-12, %v906_v26  ;;  %v859_v62 = vpop.xlane.xlu1 %858 }
 0x2c8   : > { %v885_v52 = vpop.xlane.xlu0 %884  ;;  %v1076_v24 = vadd.f32 %v2369_v16, %v1037_v31  ;;  %v1014_v58 = vmul.f32 %v1554_v46, %v2272_v61  ;;  %1563 = vrsqrt.f32 %v955_v12  ;;  %v909_v10 = vmul.f32 0.0078125, %v859_v62 }
 0x2c9   : > { %1125 = vst [vmem:[%s2376_s26 + $0xb8] sm:$0xff] %v1093_v4  ;;  %v1040_v0 = vmul.f32 %v2363_v19, %v1001_v49  ;;  %1565 = vrsqrt.f32 %v938_v34  ;;  %v922_v54 = vmul.f32 0.0078125, %v885_v52 }
 0x2ca   : > { %v1556_v1 = vpop.eup %1555  ;;  %1108 = vst [vmem:[%s2376_s26 + $0x30] sm:$0xff] %v1076_v24  ;;  %v1053_v60 = vmul.f32 %v2363_v19, %v1014_v58  ;;  %v941_v56 = vadd.f32 1e-12, %v909_v10 }
 0x2cb   : > { %v1558_v36 = vpop.eup %1557  ;;  %v1079_v32 = vadd.f32 %v2369_v16, %v1040_v0  ;;  %v1017_v63 = vmul.f32 %v1556_v1, %v2289_v35  ;;  %v954_v61 = vadd.f32 1e-12, %v922_v54  ;;  %v891_v25 = vpop.xlane.xlu1 %890 }
 0x2cc   : > { %v857_v23 = vpop.xlane.xlu0 %856  ;;  %v1092_v43 = vadd.f32 %v2369_v16, %v1053_v60  ;;  %v1000_v21 = vmul.f32 %v1558_v36, %v2284_v59  ;;  %1567 = vrsqrt.f32 %v941_v56  ;;  %v925_v11 = vmul.f32 0.0078125, %v891_v25 }
 0x2cd   : > { %1111 = vst [vmem:[%s2376_s26 + $0x48] sm:$0xff] %v1079_v32  ;;  %v1056_v17 = vmul.f32 %v2363_v19, %v1017_v63  ;;  %1569 = vrsqrt.f32 %v954_v61  ;;  %v908_v5 = vmul.f32 0.0078125, %v857_v23 }
 0x2ce   : > { %v1560_v30 = vpop.eup %1559  ;;  %1124 = vst [vmem:[%s2376_s26 + $0xb0] sm:$0xff] %v1092_v43  ;;  %v1039_v28 = vmul.f32 %v2363_v19, %v1000_v21  ;;  %v957_v35 = vadd.f32 1e-12, %v925_v11 }
 0x2cf   : > { %v1562_v13 = vpop.eup %1561  ;;  %v1095_v18 = vadd.f32 %v2369_v16, %v1056_v17  ;;  %v1003_v41 = vmul.f32 %v1560_v30, %v2299_v57  ;;  %v940_v59 = vadd.f32 1e-12, %v908_v5  ;;  %v863_v20 = vpop.xlane.xlu1 %862 }
 0x2d0   : > { %v889_v47 = vpop.xlane.xlu0 %888  ;;  %v1078_v33 = vadd.f32 %v2369_v16, %v1039_v28  ;;  %v1016_v2 = vmul.f32 %v1562_v13, %v2292_v22  ;;  %1571 = vrsqrt.f32 %v957_v35  ;;  %v911_v7 = vmul.f32 0.0078125, %v863_v20 }
 0x2d1   : > { %1127 = vst [vmem:[%s2376_s26 + $0xc8] sm:$0xff] %v1095_v18  ;;  %v1042_v51 = vmul.f32 %v2363_v19, %v1003_v41  ;;  %1573 = vrsqrt.f32 %v940_v59  ;;  %v924_v40 = vmul.f32 0.0078125, %v889_v47 }
 0x2d2   : > { %v1564_v55 = vpop.eup %1563  ;;  %1110 = vst [vmem:[%s2376_s26 + $0x40] sm:$0xff] %v1078_v33  ;;  %v1055_v39 = vmul.f32 %v2363_v19, %v1016_v2  ;;  %v943_v57 = vadd.f32 1e-12, %v911_v7 }
 0x2d3   : > { %v1566_v3 = vpop.eup %1565  ;;  %v1081_v38 = vadd.f32 %v2369_v16, %v1042_v51  ;;  %v1019_v42 = vmul.f32 %v1564_v55, %v2309_v50  ;;  %v956_v22 = vadd.f32 1e-12, %v924_v40  ;;  %v895_v45 = vpop.xlane.xlu1 %894 }
 0x2d4   : > { %v861_v26 = vpop.xlane.xlu0 %860  ;;  %v1094_v14 = vadd.f32 %v2369_v16, %v1055_v39  ;;  %v1002_v31 = vmul.f32 %v1566_v3, %v2304_v27  ;;  %1575 = vrsqrt.f32 %v943_v57  ;;  %v927_v12 = vmul.f32 0.0078125, %v895_v45 }
 0x2d5   : > { %1113 = vst [vmem:[%s2376_s26 + $0x58] sm:$0xff] %v1081_v38  ;;  %v1058_v46 = vmul.f32 %v2363_v19, %v1019_v42  ;;  %1577 = vrsqrt.f32 %v956_v22  ;;  %v910_v4 = vmul.f32 0.0078125, %v861_v26 }
 0x2d6   : > { %v1568_v49 = vpop.eup %1567  ;;  %1126 = vst [vmem:[%s2376_s26 + $0xc0] sm:$0xff] %v1094_v14  ;;  %v1041_v50 = vmul.f32 %v2363_v19, %v1002_v31  ;;  %v959_v34 = vadd.f32 1e-12, %v927_v12 }
 0x2d7   : > { %v1570_v62 = vpop.eup %1569  ;;  %v1097_v52 = vadd.f32 %v2369_v16, %v1058_v46  ;;  %v1005_v24 = vmul.f32 %v1568_v49, %v2319_v44  ;;  %v942_v27 = vadd.f32 1e-12, %v910_v4 }
 0x2d8   : > { %v893_v58 = vpop.xlane.xlu0 %892  ;;  %v1080_v10 = vadd.f32 %v2369_v16, %v1041_v50  ;;  %v1018_v0 = vmul.f32 %v1570_v62, %v2312_v37  ;;  %1579 = vrsqrt.f32 %v959_v34 }
 0x2d9   : > { %v926_v54 = vmul.f32 0.0078125, %v893_v58  ;;  %1129 = vst [vmem:[%s2376_s26 + $0xd8] sm:$0xff] %v1097_v52  ;;  %v1044_v1 = vmul.f32 %v2363_v19, %v1005_v24  ;;  %1581 = vrsqrt.f32 %v942_v27 }
 0x2da   : > { %v1572_v60 = vpop.eup %1571  ;;  %1112 = vst [vmem:[%s2376_s26 + $0x50] sm:$0xff] %v1080_v10  ;;  %v1057_v56 = vmul.f32 %v2363_v19, %v1018_v0 }
 0x2db   : > { %v958_v36 = vadd.f32 1e-12, %v926_v54  ;;  %v1574_v44 = vpop.eup %1573  ;;  %v1083_v32 = vadd.f32 %v2369_v16, %v1044_v1  ;;  %v1021_v63 = vmul.f32 %v1572_v60, %v2329_v9 }
 0x2dc   : > { %v1096_v37 = vadd.f32 %v2369_v16, %v1057_v56  ;;  %v1004_v61 = vmul.f32 %v1574_v44, %v2324_v48 }
 0x2dd   : > { %1583 = vrsqrt.f32 %v958_v36  ;;  %1115 = vst [vmem:[%s2376_s26 + $0x68] sm:$0xff] %v1083_v32  ;;  %v1060_v25 = vmul.f32 %v2363_v19, %v1021_v63 }
 0x2de   : > { %v1576_v23 = vpop.eup %1575  ;;  %1128 = vst [vmem:[%s2376_s26 + $0xd0] sm:$0xff] %v1096_v37  ;;  %v1043_v43 = vmul.f32 %v2363_v19, %v1004_v61 }
 0x2df   : > { %v1578_v21 = vpop.eup %1577  ;;  %v1099_v11 = vadd.f32 %v2369_v16, %v1060_v25  ;;  %v1007_v17 = vmul.f32 %v1576_v23, %v2339_v6 }
 0x2e0   : > { %v1082_v9 = vadd.f32 %v2369_v16, %v1043_v43  ;;  %v1020_v5 = vmul.f32 %v1578_v21, %v2332_v53 }
 0x2e1   : > { %1131 = vst [vmem:[%s2376_s26 + $0xe8] sm:$0xff] %v1099_v11  ;;  %v1046_v48 = vmul.f32 %v2363_v19, %v1007_v17 }
 0x2e2   : > { %v1580_v30 = vpop.eup %1579  ;;  %1114 = vst [vmem:[%s2376_s26 + $0x60] sm:$0xff] %v1082_v9  ;;  %v1059_v28 = vmul.f32 %v2363_v19, %v1020_v5 }
 0x2e3   : > { %v1582_v35 = vpop.eup %1581  ;;  %v1085_v13 = vadd.f32 %v2369_v16, %v1046_v48  ;;  %v1023_v6 = vmul.f32 %v1580_v30, %v2349_v29 }
 0x2e4   : > { %v1098_v18 = vadd.f32 %v2369_v16, %v1059_v28  ;;  %v1006_v53 = vmul.f32 %v1582_v35, %v2344_v15 }
 0x2e5   : > { %1117 = vst [vmem:[%s2376_s26 + $0x78] sm:$0xff] %v1085_v13  ;;  %v1062_v41 = vmul.f32 %v2363_v19, %v1023_v6 }
 0x2e6   : > { %1130 = vst [vmem:[%s2376_s26 + $0xe0] sm:$0xff] %v1098_v18  ;;  %v1045_v20 = vmul.f32 %v2363_v19, %v1006_v53 }
 0x2e7   : > { %v1584_v59 = vpop.eup %1583  ;;  %v1101_v47 = vadd.f32 %v2369_v16, %v1062_v41 }
 0x2e8   : > { %v1022_v33 = vmul.f32 %v1584_v59, %v2352_v8  ;;  %v1084_v29 = vadd.f32 %v2369_v16, %v1045_v20 }
 0x2e9   : > { %1133 = vst [vmem:[%s2376_s26 + $0xf8] sm:$0xff] %v1101_v47 }
 0x2ea   : > { %v1061_v15 = vmul.f32 %v2363_v19, %v1022_v33  ;;  %1116 = vst [vmem:[%s2376_s26 + $0x70] sm:$0xff] %v1084_v29 }
 0x2ec   : > { %v1100_v8 = vadd.f32 %v2369_v16, %v1061_v15 }
 0x2ee   : > { %1132 = vst [vmem:[%s2376_s26 + $0xf0] sm:$0xff] %v1100_v8 }
 0x2ef   : > { %1686 = shalt.err (!%p1683_p6)
}
 0x2f0   : > { %s1687_s29 = scalar_lea.hbm %s2504_s11, 4096  ;;  %s1691_s27 = scalar_lea.hbm %s2558_s6, 8192 }
 0x2f1   : > { %p1688_p8 = scmp.ne.s32.totalorder %s2504_s11, %s1687_s29  ;;  %p1692_p4 = scmp.lt.u32.totalorder %s2504_s11, %s2558_s6 }
 0x2f2   : > { %p1693_p11 = scmp.lt.u32.totalorder %s1691_s27, %s1687_s29  ;;  %p1695_p3 = scmp.lt.u32.totalorder %s1687_s29, %s2504_s11 }
 0x2f3   : > { %p1689_p10 = pnand %p1688_p8, %p1886_p12 }
 0x2f4   : > { %p1694_p13 = por %p1693_p11, %p1692_p4 }
 0x2f5   : > { %p1690_p0 = pneg %p1689_p10 }
 0x2f6   : > { %p1696_p7 = por %p1695_p3, %p1694_p13 }
 0x2f8   : > { %p1697_p9 = pnand %p1696_p7, %p1690_p0 }
 0x2fa   : > { %1700 = shalt.err (!%p1697_p9)
}
 0x2fb   : > { %s1755_s12 = smov 128   ;;  %s1756_s10 = smov 8  }
 0x2fc   : > { %1463 = dma.vmem_to_hbm [thread:$0]  (%p1886_p12), %s2506_s23, 4096, %s2504_s11, %s1135_s25, %s1755_s12, %s1755_s12, %s1756_s10  }
 0x2fd PF: > { %s1163_s8 = sand.u32 1, %s1735_s21   ;;  %p2589_p1 = scmp.ne.s32.totalorder %s2573_s28, 0 }
 0x2fe   : > { %p2590_p5 = scmp.ge.s32.totalorder %s1747_s24, 2  ;;  %s1164_s26 = scalar_lea.sflag [#allocation4], %s1163_s8 }
 0x300   : > { %p1477_p2 = pnand %p2590_p5, %p2589_p1 }
 0x302   : > { %1730 = dma.done.wait (!%p1477_p2), %s1164_s26, 4096  }
 0x303   : > { %1732 = vsyncadd (!%p1477_p2), %s1164_s26, 4294963200  ;;  %s2591_s24 = sld [smem:[#allocation14_spill]]  ;;  %s2592_s15 = sld [smem:[#allocation13_spill]] }
 0x304   : > { %s2593_s23 = sld [smem:[#allocation15_spill]]  ;;  %s2594_s21 = smov %s1739_s22 }
 0x309   : > { %p22_p6 = scmp.ge.s32.totalorder %s2591_s24, 4   ;;  %s2595_s22 = smov %s2592_s15 }
 0x30b   :  { %24 = sbr.rel (!%p22_p6) target bundleno = 10 (0xa), region = 106 }
 0x312   :  { %1169 = vsyncpa [#allocation3], 1 }
 0x313   :  { %1171 = vsyncpa [#allocation3 + $0x1], 1 }
 0x314   :  { %1172 = vsyncpa [#allocation6], 1 }
 0x315   :  { %1174 = vsyncpa [#allocation6 + $0x1], 1 }
 0x316   :  { %1175 = vsyncpa [#allocation4], 1 }
 0x317   :  { %1177 = vsyncpa [#allocation4 + $0x1], 1 }

</bundles_post_ra>
